<compile_context>
chip_gen: v7x
topology: tpu7x:2x2x1
jax: 0.10.0
libtpu: 0.0.40
codegen_flags: <defaults>
</compile_context>

<pallas_src>
import functools

import jax
import jax.numpy as jnp
from jax.experimental import pallas as pl
from jax.experimental.pallas import tpu as pltpu

_NEG = -1e30  # finite "-inf" for masking (avoids inf-inf NaN hazards)


def _round_up(x, m):
    return (x + m - 1) // m * m


def _cdiv(a, b):
    return (a + b - 1) // b


def _ce_ls_kernel(logits_ref, xlbl_ref, bw_ref, out_ref,
                  m_sc, l_sc, sumx_sc,
                  *, sf, num_classes, valid_last, masked_last):
    c = pl.program_id(1)
    last = pl.num_programs(1) - 1

    @pl.when(c == 0)
    def _():
        m_sc[...] = jnp.full_like(m_sc, _NEG)
        l_sc[...] = jnp.zeros_like(l_sc)
        sumx_sc[...] = jnp.zeros_like(sumx_sc)

    x = logits_ref[...].astype(jnp.float32)            # (TB, TC), cast per-tile
    # Raw-logit row sum for the folded label-smoothing term. Padded class
    # columns are zero in HBM, so no masking is ever required here.
    x_sum = jnp.sum(x, axis=1, keepdims=True)

    def update(x_lse):
        # Online logsumexp + running raw-logit sum. Each scratch is read once
        # and written once per step.
        m_old = m_sc[...]
        m_new = jnp.maximum(m_old, jnp.max(x_lse, axis=1, keepdims=True))
        l_sc[...] = (l_sc[...] * jnp.exp(m_old - m_new)
                     + jnp.sum(jnp.exp(x_lse - m_new), axis=1, keepdims=True))
        m_sc[...] = m_new
        sumx_sc[...] = sumx_sc[...] + x_sum

    if masked_last:
        # Padding exists only in the last C tile: keep every other tile on an
        # unmasked fast path (no iota / compare / select).
        @pl.when(c != last)
        def _():
            update(x)

        @pl.when(c == last)
        def _():
            lane = jax.lax.broadcasted_iota(jnp.int32, x.shape, 1)
            update(jnp.where(lane < valid_last, x, _NEG))
    else:
        update(x)

    @pl.when(c == last)
    def _():
        lse = m_sc[...] + jnp.log(l_sc[...])
        off = sf / (num_classes - 1) if num_classes > 1 else 0.0
        val = (off * (sumx_sc[...] - num_classes * lse)
               + (1.0 - sf - off) * (xlbl_ref[...] - lse))
        # Per-row (weighted) smoothed-CE contribution; sign/normalization in wrapper.
        out_ref[...] = bw_ref[...] * val


def cross_entropy_with_ls(logits, labels, weight=None, smooth_factor=0.1,
                          tb_max=256, tc_max=8192):
    """Pallas TPU implementation of CrossEntropywithLS.forward.

    logits: (B, C) float array (any float dtype), labels: (B,) ints,
    weight: optional (C,) floats. Returns a scalar float32 loss.
    """
    B, C = logits.shape
    itemsize = logits.dtype.itemsize

    # Tile sizes: lane-aligned C tile (halved cap for 4-byte dtypes so the f32
    # per-tile working set stays inside the v7x 64 MiB VMEM budget), and a
    # sublane-aligned B tile chosen so there are >= 2 B-tiles whenever possible
    # (engages both v7x TensorCores via the "parallel" grid axis).
    tc_cap = tc_max if itemsize <= 2 else max(128, tc_max // 2)
    TC = min(_round_up(C, 128), tc_cap)
    TB = min(_round_up(max(_cdiv(B, 2), 1), 8), tb_max)
    Bp = _round_up(B, TB)
    Cp = _round_up(C, TC)
    masked_last = Cp != C
    valid_last = C - (Cp - TC)          # valid lanes in the final C tile (static)

    # Pad only when needed (zeros). Padded class columns are masked inside the
    # kernel for the logsumexp (and contribute 0 to the raw-logit sum); padded
    # batch rows get batch_weight == 0 (and x_label == 0) so they contribute 0.
    x = logits
    if (Bp, Cp) != (B, C):
        x = jnp.pad(x, ((0, Bp - B), (0, Cp - C)))

    # O(B) wrapper gathers (label logit + per-sample class weight).
    xlbl = jnp.take_along_axis(
        logits, labels.astype(jnp.int32).reshape(B, 1), axis=1
    ).astype(jnp.float32)
    if weight is not None:
        # NOTE: matches the module __init__; a zero/negative weight entry would
        # produce inf/NaN exactly like the PyTorch reference.
        w = (weight / jnp.min(weight)).astype(jnp.float32)
        bw = w[labels].reshape(B, 1)
    else:
        bw = jnp.ones((B, 1), jnp.float32)
    if Bp != B:
        xlbl = jnp.pad(xlbl, ((0, Bp - B), (0, 0)))
        bw = jnp.pad(bw, ((0, Bp - B), (0, 0)))

    # VMEM budget: double-buffered logits tile + ~5 f32 per-tile temporaries,
    # with a floor of 32 MiB and a cap of 56 MiB (v7x has 64 MiB physical).
    vmem_bytes = 2 * TB * TC * itemsize + 5 * TB * TC * 4 + (2 << 20)
    vmem_limit = int(min(max(vmem_bytes, 32 << 20), 56 << 20))

    grid = (Bp // TB, Cp // TC)
    kernel = functools.partial(
        _ce_ls_kernel, sf=float(smooth_factor), num_classes=C,
        valid_last=valid_last, masked_last=masked_last)

    row_losses = pl.pallas_call(
        kernel,
        out_shape=jax.ShapeDtypeStruct((Bp, 1), jnp.float32),
        grid_spec=pltpu.PrefetchScalarGridSpec(
            num_scalar_prefetch=0,
            grid=grid,
            in_specs=[
                pl.BlockSpec((TB, TC), lambda b, c: (b, c)),   # logits tile
                pl.BlockSpec((TB, 1), lambda b, c: (b, 0)),    # label-logit column
                pl.BlockSpec((TB, 1), lambda b, c: (b, 0)),    # batch_weight column
            ],
            out_specs=pl.BlockSpec((TB, 1), lambda b, c: (b, 0)),
            scratch_shapes=[
                pltpu.VMEM((TB, 1), jnp.float32),   # running max m
                pltpu.VMEM((TB, 1), jnp.float32),   # running sum l
                pltpu.VMEM((TB, 1), jnp.float32),   # running raw-logit sum
            ],
        ),
        compiler_params=pltpu.CompilerParams(
            dimension_semantics=("parallel", "arbitrary"),
            vmem_limit_bytes=vmem_limit),
        cost_estimate=pl.CostEstimate(
            flops=5 * B * C,
            transcendentals=B * C,
            bytes_accessed=B * C * itemsize + 4 * B * 4,
        ),
    )(x, xlbl, bw)

    return -jnp.sum(row_losses[:B, 0]) / B


def _reference(logits, labels, weight=None, smooth_factor=0.1):
    """Pure-JAX reference mirroring the PyTorch module."""
    B, C = logits.shape
    smoothed = jnp.full((B, C), smooth_factor / (C - 1), dtype=jnp.float32)
    smoothed = smoothed.at[jnp.arange(B), labels].set(1.0 - smooth_factor)
    log_prob = jax.nn.log_softmax(logits.astype(jnp.float32), axis=1)
    if weight is not None:
        w = weight / jnp.min(weight)
        log_prob = log_prob * w[labels][:, None]
    return -jnp.sum(log_prob * smoothed) / B


if __name__ == "__main__":
    key = jax.random.PRNGKey(0)
    k_logits, k_labels, k_weight, k2_logits, k2_labels = jax.random.split(key, 5)

    # Small demo shape consistent with the module (batch=8 samples, 32 classes).
    B, C = 8, 32
    logits = jax.random.normal(k_logits, (B, C), dtype=jnp.float32)
    labels = jax.random.randint(k_labels, (B,), 0, C, dtype=jnp.int32)
    weight = jax.random.uniform(k_weight, (C,), minval=0.5, maxval=2.0,
                                dtype=jnp.float32)

    loss = jax.block_until_ready(
        cross_entropy_with_ls(logits, labels, weight=weight, smooth_factor=0.1))
    ref = _reference(logits, labels, weight=weight, smooth_factor=0.1)
    assert jnp.allclose(loss, ref, rtol=1e-5, atol=1e-5), (loss, ref)

    # weight=None path.
    loss_nw = jax.block_until_ready(
        cross_entropy_with_ls(logits, labels, weight=None, smooth_factor=0.1))
    ref_nw = _reference(logits, labels, weight=None, smooth_factor=0.1)
    assert jnp.allclose(loss_nw, ref_nw, rtol=1e-5, atol=1e-5), (loss_nw, ref_nw)

    # Multi-tile path (forces a 2x3 grid: online logsumexp across C tiles with a
    # masked ragged final tile, and 2 B-tiles on the parallel axis).
    B2, C2 = 16, 300
    logits2 = jax.random.normal(k2_logits, (B2, C2), dtype=jnp.bfloat16)
    labels2 = jax.random.randint(k2_labels, (B2,), 0, C2, dtype=jnp.int32)
    loss2 = jax.block_until_ready(
        cross_entropy_with_ls(logits2, labels2, weight=None, smooth_factor=0.1,
                              tb_max=8, tc_max=128))
    ref2 = _reference(logits2, labels2, weight=None, smooth_factor=0.1)
    assert jnp.allclose(loss2, ref2, rtol=2e-2, atol=2e-2), (loss2, ref2)

    print("KERNEL_OK")
</pallas_src>

<mosaic_0001>
module attributes {stable_mosaic.version = 11 : i64} {
  func.func @_ce_ls_kernel(%arg0: i32, %arg1: i32, %arg2: memref<8x128xf32, #tpu.memory_space<vmem>>, %arg3: memref<8x1xf32, #tpu.memory_space<vmem>>, %arg4: memref<8x1xf32, #tpu.memory_space<vmem>>, %arg5: memref<8x1xf32, #tpu.memory_space<vmem>>, %arg6: memref<8x1xf32, #tpu.memory_space<vmem>>, %arg7: memref<8x1xf32, #tpu.memory_space<vmem>>, %arg8: memref<8x1xf32, #tpu.memory_space<vmem>>) attributes {dimension_semantics = [#tpu.dimension_semantics<parallel>, #tpu.dimension_semantics<arbitrary>], iteration_bounds = array<i64: 1, 1>, scalar_prefetch = 0 : i64, scratch_operands = 3 : i64, tpu.core_type = #tpu.core_type<tc>, window_params = [{transform_indices = @transform_0, window_bounds = array<i64: 8, 128>}, {transform_indices = @transform_1, window_bounds = array<i64: 8, 1>}, {transform_indices = @transform_2, window_bounds = array<i64: 8, 1>}, {transform_indices = @transform_3, window_bounds = array<i64: 8, 1>}]} {
    %c0_i32 = arith.constant 0 : i32
    %0 = arith.cmpi eq, %arg1, %c0_i32 : i32
    %1 = arith.extui %0 : i1 to i32
    %c0_i32_0 = arith.constant 0 : i32
    %2 = arith.cmpi ne, %1, %c0_i32_0 : i32
    scf.if %2 {
      %cst_8 = arith.constant -1.000000e+30 : f32
      %15 = vector.broadcast %cst_8 : f32 to vector<8x1xf32>
      %c0_9 = arith.constant 0 : index
      %c0_10 = arith.constant 0 : index
      %16 = vector.load %arg6[%c0_9, %c0_10] : memref<8x1xf32, #tpu.memory_space<vmem>>, vector<8x1xf32>
      tpu.vector_store %arg6[%c0_9, %c0_10], %15 {strides = array<i32>} : memref<8x1xf32, #tpu.memory_space<vmem>>, vector<8x1xf32>,
      %cst_11 = arith.constant 0.000000e+00 : f32
      %17 = vector.broadcast %cst_11 : f32 to vector<8x1xf32>
      %c0_12 = arith.constant 0 : index
      %c0_13 = arith.constant 0 : index
      %18 = vector.load %arg7[%c0_12, %c0_13] : memref<8x1xf32, #tpu.memory_space<vmem>>, vector<8x1xf32>
      tpu.vector_store %arg7[%c0_12, %c0_13], %17 {strides = array<i32>} : memref<8x1xf32, #tpu.memory_space<vmem>>, vector<8x1xf32>,
      %cst_14 = arith.constant 0.000000e+00 : f32
      %19 = vector.broadcast %cst_14 : f32 to vector<8x1xf32>
      %c0_15 = arith.constant 0 : index
      %c0_16 = arith.constant 0 : index
      %20 = vector.load %arg8[%c0_15, %c0_16] : memref<8x1xf32, #tpu.memory_space<vmem>>, vector<8x1xf32>
      tpu.vector_store %arg8[%c0_15, %c0_16], %19 {strides = array<i32>} : memref<8x1xf32, #tpu.memory_space<vmem>>, vector<8x1xf32>,
    } else {
    }
    %c0 = arith.constant 0 : index
    %c0_1 = arith.constant 0 : index
    %3 = vector.load %arg2[%c0, %c0_1] : memref<8x128xf32, #tpu.memory_space<vmem>>, vector<8x128xf32>
    %cst = arith.constant dense<0.000000e+00> : vector<8xf32>
    %4 = vector.multi_reduction <add>, %3, %cst [1] : vector<8x128xf32> to vector<8xf32>
    %5 = vector.shape_cast %4 : vector<8xf32> to vector<8x1xf32>
    %c0_i32_2 = arith.constant 0 : i32
    %6 = arith.cmpi ne, %arg1, %c0_i32_2 : i32
    %7 = arith.extui %6 : i1 to i32
    %c0_i32_3 = arith.constant 0 : i32
    %8 = arith.cmpi ne, %7, %c0_i32_3 : i32
    scf.if %8 {
      %c0_8 = arith.constant 0 : index
      %c0_9 = arith.constant 0 : index
      %15 = vector.load %arg6[%c0_8, %c0_9] : memref<8x1xf32, #tpu.memory_space<vmem>>, vector<8x1xf32>
      %cst_10 = arith.constant dense<0xFF800000> : vector<8xf32>
      %16 = vector.multi_reduction <maximumf>, %3, %cst_10 [1] : vector<8x128xf32> to vector<8xf32>
      %17 = vector.shape_cast %16 : vector<8xf32> to vector<8x1xf32>
      %18 = arith.maximumf %15, %17 : vector<8x1xf32>
      %c0_11 = arith.constant 0 : index
      %c0_12 = arith.constant 0 : index
      %19 = vector.load %arg7[%c0_11, %c0_12] : memref<8x1xf32, #tpu.memory_space<vmem>>, vector<8x1xf32>
      %20 = arith.subf %15, %18 : vector<8x1xf32>
      %21 = math.exp %20 : vector<8x1xf32>
      %22 = arith.mulf %19, %21 : vector<8x1xf32>
      %23 = vector.broadcast %18 : vector<8x1xf32> to vector<8x128xf32>
      %24 = arith.subf %3, %23 : vector<8x128xf32>
      %25 = math.exp %24 : vector<8x128xf32>
      %cst_13 = arith.constant dense<0.000000e+00> : vector<8xf32>
      %26 = vector.multi_reduction <add>, %25, %cst_13 [1] : vector<8x128xf32> to vector<8xf32>
      %27 = vector.shape_cast %26 : vector<8xf32> to vector<8x1xf32>
      %28 = arith.addf %22, %27 : vector<8x1xf32>
      %c0_14 = arith.constant 0 : index
      %c0_15 = arith.constant 0 : index
      %29 = vector.load %arg7[%c0_14, %c0_15] : memref<8x1xf32, #tpu.memory_space<vmem>>, vector<8x1xf32>
      tpu.vector_store %arg7[%c0_14, %c0_15], %28 {strides = array<i32>} : memref<8x1xf32, #tpu.memory_space<vmem>>, vector<8x1xf32>,
      %c0_16 = arith.constant 0 : index
      %c0_17 = arith.constant 0 : index
      %30 = vector.load %arg6[%c0_16, %c0_17] : memref<8x1xf32, #tpu.memory_space<vmem>>, vector<8x1xf32>
      tpu.vector_store %arg6[%c0_16, %c0_17], %18 {strides = array<i32>} : memref<8x1xf32, #tpu.memory_space<vmem>>, vector<8x1xf32>,
      %c0_18 = arith.constant 0 : index
      %c0_19 = arith.constant 0 : index
      %31 = vector.load %arg8[%c0_18, %c0_19] : memref<8x1xf32, #tpu.memory_space<vmem>>, vector<8x1xf32>
      %32 = arith.addf %31, %5 : vector<8x1xf32>
      %c0_20 = arith.constant 0 : index
      %c0_21 = arith.constant 0 : index
      %33 = vector.load %arg8[%c0_20, %c0_21] : memref<8x1xf32, #tpu.memory_space<vmem>>, vector<8x1xf32>
      tpu.vector_store %arg8[%c0_20, %c0_21], %32 {strides = array<i32>} : memref<8x1xf32, #tpu.memory_space<vmem>>, vector<8x1xf32>,
    } else {
    }
    %c0_i32_4 = arith.constant 0 : i32
    %9 = arith.cmpi eq, %arg1, %c0_i32_4 : i32
    %10 = arith.extui %9 : i1 to i32
    %c0_i32_5 = arith.constant 0 : i32
    %11 = arith.cmpi ne, %10, %c0_i32_5 : i32
    scf.if %11 {
      %15 = tpu.iota {dimensions = array<i32: 1>} : vector<8x128xi32>
      %c32_i32 = arith.constant 32 : i32
      %16 = vector.broadcast %c32_i32 : i32 to vector<8x128xi32>
      %17 = arith.cmpi slt, %15, %16 : vector<8x128xi32>
      %cst_8 = arith.constant -1.000000e+30 : f32
      %18 = vector.broadcast %cst_8 : f32 to vector<8x128xf32>
      %19 = arith.select %17, %3, %18 : vector<8x128xi1>, vector<8x128xf32>
      %c0_9 = arith.constant 0 : index
      %c0_10 = arith.constant 0 : index
      %20 = vector.load %arg6[%c0_9, %c0_10] : memref<8x1xf32, #tpu.memory_space<vmem>>, vector<8x1xf32>
      %cst_11 = arith.constant dense<0xFF800000> : vector<8xf32>
      %21 = vector.multi_reduction <maximumf>, %19, %cst_11 [1] : vector<8x128xf32> to vector<8xf32>
      %22 = vector.shape_cast %21 : vector<8xf32> to vector<8x1xf32>
      %23 = arith.maximumf %20, %22 : vector<8x1xf32>
      %c0_12 = arith.constant 0 : index
      %c0_13 = arith.constant 0 : index
      %24 = vector.load %arg7[%c0_12, %c0_13] : memref<8x1xf32, #tpu.memory_space<vmem>>, vector<8x1xf32>
      %25 = arith.subf %20, %23 : vector<8x1xf32>
      %26 = math.exp %25 : vector<8x1xf32>
      %27 = arith.mulf %24, %26 : vector<8x1xf32>
      %28 = vector.broadcast %23 : vector<8x1xf32> to vector<8x128xf32>
      %29 = arith.subf %19, %28 : vector<8x128xf32>
      %30 = math.exp %29 : vector<8x128xf32>
      %cst_14 = arith.constant dense<0.000000e+00> : vector<8xf32>
      %31 = vector.multi_reduction <add>, %30, %cst_14 [1] : vector<8x128xf32> to vector<8xf32>
      %32 = vector.shape_cast %31 : vector<8xf32> to vector<8x1xf32>
      %33 = arith.addf %27, %32 : vector<8x1xf32>
      %c0_15 = arith.constant 0 : index
      %c0_16 = arith.constant 0 : index
      %34 = vector.load %arg7[%c0_15, %c0_16] : memref<8x1xf32, #tpu.memory_space<vmem>>, vector<8x1xf32>
      tpu.vector_store %arg7[%c0_15, %c0_16], %33 {strides = array<i32>} : memref<8x1xf32, #tpu.memory_space<vmem>>, vector<8x1xf32>,
      %c0_17 = arith.constant 0 : index
      %c0_18 = arith.constant 0 : index
      %35 = vector.load %arg6[%c0_17, %c0_18] : memref<8x1xf32, #tpu.memory_space<vmem>>, vector<8x1xf32>
      tpu.vector_store %arg6[%c0_17, %c0_18], %23 {strides = array<i32>} : memref<8x1xf32, #tpu.memory_space<vmem>>, vector<8x1xf32>,
      %c0_19 = arith.constant 0 : index
      %c0_20 = arith.constant 0 : index
      %36 = vector.load %arg8[%c0_19, %c0_20] : memref<8x1xf32, #tpu.memory_space<vmem>>, vector<8x1xf32>
      %37 = arith.addf %36, %5 : vector<8x1xf32>
      %c0_21 = arith.constant 0 : index
      %c0_22 = arith.constant 0 : index
      %38 = vector.load %arg8[%c0_21, %c0_22] : memref<8x1xf32, #tpu.memory_space<vmem>>, vector<8x1xf32>
      tpu.vector_store %arg8[%c0_21, %c0_22], %37 {strides = array<i32>} : memref<8x1xf32, #tpu.memory_space<vmem>>, vector<8x1xf32>,
    } else {
    }
    %c0_i32_6 = arith.constant 0 : i32
    %12 = arith.cmpi eq, %arg1, %c0_i32_6 : i32
    %13 = arith.extui %12 : i1 to i32
    %c0_i32_7 = arith.constant 0 : i32
    %14 = arith.cmpi ne, %13, %c0_i32_7 : i32
    scf.if %14 {
      %c0_8 = arith.constant 0 : index
      %c0_9 = arith.constant 0 : index
      %15 = vector.load %arg6[%c0_8, %c0_9] : memref<8x1xf32, #tpu.memory_space<vmem>>, vector<8x1xf32>
      %c0_10 = arith.constant 0 : index
      %c0_11 = arith.constant 0 : index
      %16 = vector.load %arg7[%c0_10, %c0_11] : memref<8x1xf32, #tpu.memory_space<vmem>>, vector<8x1xf32>
      %17 = math.log %16 : vector<8x1xf32>
      %18 = arith.addf %15, %17 : vector<8x1xf32>
      %c0_12 = arith.constant 0 : index
      %c0_13 = arith.constant 0 : index
      %19 = vector.load %arg8[%c0_12, %c0_13] : memref<8x1xf32, #tpu.memory_space<vmem>>, vector<8x1xf32>
      %cst_14 = arith.constant 3.200000e+01 : f32
      %20 = vector.broadcast %cst_14 : f32 to vector<8x1xf32>
      %21 = arith.mulf %20, %18 : vector<8x1xf32>
      %22 = arith.subf %19, %21 : vector<8x1xf32>
      %cst_15 = arith.constant 0.0032258064 : f32
      %23 = vector.broadcast %cst_15 : f32 to vector<8x1xf32>
      %24 = arith.mulf %23, %22 : vector<8x1xf32>
      %c0_16 = arith.constant 0 : index
      %c0_17 = arith.constant 0 : index
      %25 = vector.load %arg3[%c0_16, %c0_17] : memref<8x1xf32, #tpu.memory_space<vmem>>, vector<8x1xf32>
      %26 = arith.subf %25, %18 : vector<8x1xf32>
      %cst_18 = arith.constant 0.896774172 : f32
      %27 = vector.broadcast %cst_18 : f32 to vector<8x1xf32>
      %28 = arith.mulf %27, %26 : vector<8x1xf32>
      %29 = arith.addf %24, %28 : vector<8x1xf32>
      %c0_19 = arith.constant 0 : index
      %c0_20 = arith.constant 0 : index
      %30 = vector.load %arg4[%c0_19, %c0_20] : memref<8x1xf32, #tpu.memory_space<vmem>>, vector<8x1xf32>
      %31 = arith.mulf %30, %29 : vector<8x1xf32>
      %c0_21 = arith.constant 0 : index
      %c0_22 = arith.constant 0 : index
      %32 = vector.load %arg5[%c0_21, %c0_22] : memref<8x1xf32, #tpu.memory_space<vmem>>, vector<8x1xf32>
      tpu.vector_store %arg5[%c0_21, %c0_22], %31 {strides = array<i32>} : memref<8x1xf32, #tpu.memory_space<vmem>>, vector<8x1xf32>,
    } else {
    }
    return
  }
  func.func @transform_0(%arg0: i32, %arg1: i32) -> (i32, i32) {
    %c0_i32 = arith.constant 0 : i32
    return %arg0, %arg1 : i32, i32
  }
  func.func @transform_1(%arg0: i32, %arg1: i32) -> (i32, i32) {
    %c0_i32 = arith.constant 0 : i32
    %c0_i32_0 = arith.constant 0 : i32
    return %arg0, %c0_i32 : i32, i32
  }
  func.func @transform_2(%arg0: i32, %arg1: i32) -> (i32, i32) {
    %c0_i32 = arith.constant 0 : i32
    %c0_i32_0 = arith.constant 0 : i32
    return %arg0, %c0_i32 : i32, i32
  }
  func.func @transform_3(%arg0: i32, %arg1: i32) -> (i32, i32) {
    %c0_i32 = arith.constant 0 : i32
    %c0_i32_0 = arith.constant 0 : i32
    return %arg0, %c0_i32 : i32, i32
  }
}

</mosaic_0001>

<bundles_post_ra>
// kernel: tpu_custom_call.1
= control target key start
LH: loop header
LB: loop body
LE: loop exit
PB: predicated region body
PF: predicated region fallthrough
CT: control target
= control target key end

     0   :  { %v58_v0 = vlaneseq  ;;  %vm18_vm0 = vcmask 7168   ;;  %v118_v1 = vmov -1e+30   ;;  %v119_v5 = vmov 0   ;;  %s160_s0 = inlined_call_operand.vmem [shape: f32[8,128], index: 0, kind: input, shape index: {}]   ;;  %s161_s1 = inlined_call_operand.vmem [shape: f32[8,1], index: 1, kind: input, shape index: {}]   ;;  %s162_s2 = inlined_call_operand.vmem [shape: f32[8,1], index: 2, kind: input, shape index: {}]   ;;  %s163_s3 = inlined_call_operand.vmem [shape: f32[8,1], index: 3, kind: output, shape index: {}]  }
   0x1   :  { %19 = vst.msk [vmem:[#allocation2] sm:$0xff] %vm18_vm0, %v118_v1  ;;  %v22_v2 = vld [vmem:[%s160_s0] sm:$0xff]  ;;  %111 = vset.pattern.permute.xlu0 %v119_v5  ;;  %v120_v6 = vmov 0.0  }
   0x2   :  { %v59_v3 = vand.u32 127, %v58_v0  ;;  %20 = vst.msk [vmem:[#allocation3] sm:$0xff] %vm18_vm0, %v120_v6  ;;  %21 = vst.msk [vmem:[#allocation4] sm:$0xff] %vm18_vm0, %v120_v6  ;;  %v97_v28 = vld [vmem:[%s161_s1] sm:$0xff] }
   0x3   :  { %v101_v36 = vld [vmem:[%s162_s2] sm:$0xff] }
   0x4   :  { %vm60_vm1 = vcmp.lt.s32.totalorder %v59_v3, 32 }
   0x5   :  { %v61_v4 = vsel %vm60_vm1, %v22_v2, -1e+30 }
   0x6   :  { %63 = vmax.xlane.f32.xlu0 %v61_v4 }
   0x8   :  { %v62_v7 = vld [vmem:[#allocation2] sm:$0xff] }
   0x9   :  { %v66_v17 = vld [vmem:[#allocation3] sm:$0xff]  ;;  %v85_v21 = vld [vmem:[#allocation4] sm:$0xff] }
  0x93   :  { %v64_v8 = vpop.xlane.xlu0 %63 }
  0x94   :  { %v65_v9 = vmax.f32 %v62_v7, %v64_v8 }
  0x96   :  { %v67_v10 = vsub.f32 %v62_v7, %v65_v9  ;;  %84 = vst.msk [vmem:[#allocation2] sm:$0xff] %vm18_vm0, %v65_v9  ;;  %73 = vperm.xlu0 %111, %v65_v9  }
  0x98   :  { %v68_v15 = vmul.f32 1.442695, %v67_v10 }
  0x9d   :  { %v88_v27 = vld [vmem:[#allocation2] sm:$0xff] }
 0x115   :  { %v74_v11 = vpop.permute.xlu0 %73 }
 0x116   :  { %v76_v12 = vsub.f32 %v61_v4, %v74_v11 }
 0x118   :  { %v77_v13 = vmul.f32 1.442695, %v76_v12 }
 0x11a   :  { %112 = vpow2.f32 %v77_v13 }
 0x11b   :  { %114 = vpow2.f32 %v68_v15 }
 0x124   :  { %v113_v14 = vpop.eup %112 }
 0x125   :  { %79 = vadd.xlane.f32.xlu1 %v113_v14  ;;  %v115_v16 = vpop.eup %114 }
 0x126   :  { %v70_v18 = vmul.f32 %v115_v16, %v66_v17 }
 0x129   :  { %23 = vadd.xlane.f32.xlu1 %v22_v2 }
 0x1b2   :  { %v80_v19 = vpop.xlane.xlu1 %79 }
 0x1b3   :  { %v81_v20 = vadd.f32 %v80_v19, %v70_v18 }
 0x1b5   :  { %83 = vst.msk [vmem:[#allocation3] sm:$0xff] %vm18_vm0, %v81_v20 }
 0x1b6   :  { %v24_v22 = vpop.xlane.xlu1 %23 }
 0x1b7   :  { %v86_v23 = vadd.f32 %v85_v21, %v24_v22 }
 0x1b9   :  { %87 = vst.msk [vmem:[#allocation4] sm:$0xff] %vm18_vm0, %v86_v23 }
 0x1bc   :  { %v89_v24 = vld [vmem:[#allocation3] sm:$0xff] }
 0x1bd   :  { %116 = vlog2.f32 %v89_v24 }
 0x1c0   :  { %v93_v30 = vld [vmem:[#allocation4] sm:$0xff] }
 0x1c7   :  { %v117_v25 = vpop.eup %116 }
 0x1c8   :  { %v91_v26 = vmul.f32 0.6931472, %v117_v25 }
 0x1ca   :  { %v92_v29 = vadd.f32 %v91_v26, %v88_v27 }
 0x1cc   :  { %v94_v31 = vmul.f32 32.0, %v92_v29  ;;  %v98_v32 = vsub.f32 %v97_v28, %v92_v29 }
 0x1ce   :  { %v95_v33 = vsub.f32 %v93_v30, %v94_v31  ;;  %v99_v35 = vmul.f32 0.8967742, %v98_v32 }
 0x1d0   :  { %v96_v34 = vmul.f32 0.0032258064, %v95_v33 }
 0x1d2   :  { %v100_v37 = vadd.f32 %v99_v35, %v96_v34 }
 0x1d4   :  { %v102_v38 = vmul.f32 %v101_v36, %v100_v37 }
 0x1d6   :  { %103 = vst.msk [vmem:[%s163_s3] sm:$0xff] %vm18_vm0, %v102_v38 }

</bundles_post_ra>
